<compile_context>
chip_gen: v5e
topology: v5e:2x2
jax: 0.10.0
libtpu: 0.0.40
codegen_flags: <defaults>
</compile_context>

<pallas_src>
import jax
import jax.numpy as jnp
from jax import lax
from jax.experimental import pallas as pl
from jax.experimental.pallas import tpu as pltpu


def _round_up(x, m):
    return ((x + m - 1) // m) * m


# ---------------------------------------------------------------------------
# Pallas kernel: 1x1-conv projection (bf16 MXU matmul + f32 bias) on (M, E) tiles
# ---------------------------------------------------------------------------
def _proj_kernel(feat_ref, w_ref, b_ref, out_ref):
    # feat_ref: (TM, C)   bf16
    # w_ref   : (C, TE)   bf16
    # b_ref   : (1, TE)   f32
    # out_ref : (TM, TE)  out dtype
    acc = jnp.dot(feat_ref[...], w_ref[...],
                  preferred_element_type=jnp.float32)   # MXU, f32 accumulate
    acc = acc + b_ref[...]                              # broadcast bias (VPU)
    out_ref[...] = acc.astype(out_ref.dtype)


def hybrid_embed_proj(feat_bnc, proj_w, proj_b, *, tm=256, te=256):
    """feat_bnc: (B, N, C); proj_w: (C, E); proj_b: (E,) -> (B, N, E)."""
    B, N, C = feat_bnc.shape
    E = proj_w.shape[1]
    out_dtype = feat_bnc.dtype

    # Flatten batch*patches into one M axis (free view).
    M = B * N
    feat = feat_bnc.reshape(M, C)

    # Tile sizes: TM multiple of 8 (sublanes), TE multiple of 128 (lane-dense);
    # shrink to fit tiny demo shapes.
    tm = min(tm, _round_up(M, 8))
    te = min(te, _round_up(E, 128))
    Mp = _round_up(M, tm)
    Ep = _round_up(E, te)

    # Pad M (rows) and E (lanes) so every block is full -> unmasked stores.
    if Mp != M:
        feat = jnp.pad(feat, ((0, Mp - M), (0, 0)))
    w = proj_w
    b = proj_b
    if Ep != E:
        w = jnp.pad(w, ((0, 0), (0, Ep - E)))
        b = jnp.pad(b, (0, Ep - E))

    # bf16 operands for the MXU; f32 accumulation + f32 bias keep accuracy.
    feat_bf = feat.astype(jnp.bfloat16)
    w_bf = w.astype(jnp.bfloat16)
    bias2d = b.reshape(1, Ep).astype(jnp.float32)

    grid = (Mp // tm, Ep // te)   # E innermost -> feature tile resident in VMEM

    cost = pl.CostEstimate(
        flops=2 * M * C * E,
        transcendentals=0,
        bytes_accessed=(Mp * C * 2 + C * Ep * 2 + Ep * 4
                        + Mp * Ep * jnp.dtype(out_dtype).itemsize),
    )

    out = pl.pallas_call(
        _proj_kernel,
        out_shape=jax.ShapeDtypeStruct((Mp, Ep), out_dtype),
        grid_spec=pltpu.PrefetchScalarGridSpec(
            num_scalar_prefetch=0,
            grid=grid,
            in_specs=[
                pl.BlockSpec((tm, C), lambda m, e: (m, 0)),   # feature tile
                pl.BlockSpec((C, te), lambda m, e: (0, e)),   # weight tile
                pl.BlockSpec((1, te), lambda m, e: (0, e)),   # bias tile
            ],
            out_specs=pl.BlockSpec((tm, te), lambda m, e: (m, e)),
        ),
        compiler_params=pltpu.CompilerParams(
            dimension_semantics=("parallel", "parallel"),
            vmem_limit_bytes=32 * 1024 * 1024,
        ),
        cost_estimate=cost,
    )(feat_bf, w_bf, bias2d)

    # Strip padding, restore (B, N, E).
    return out[:M, :E].reshape(B, N, E)


# ---------------------------------------------------------------------------
# Synthetic backbone (plain JAX glue): strided 3x3 conv + ReLU, NCHW in, NHWC out
# ---------------------------------------------------------------------------
def backbone_forward(x_nchw, bb_w, bb_b, stride=4):
    # x_nchw: (B, Cin, H, W); bb_w: (Cfeat, Cin, 3, 3); bb_b: (Cfeat,)
    # Emit NHWC so the flatten to (B, N, Cfeat) is a free view (no transpose).
    y = lax.conv_general_dilated(
        x_nchw, bb_w,
        window_strides=(stride, stride),
        padding="SAME",
        dimension_numbers=("NCHW", "OIHW", "NHWC"),
    )
    y = y + bb_b.reshape(1, 1, 1, -1)
    return jnp.maximum(y, 0.0)                      # (B, Hf, Wf, Cfeat)


# ---------------------------------------------------------------------------
# Full HybridEmbed forward
# ---------------------------------------------------------------------------
def hybrid_embed_forward(x_nchw, params):
    feat = backbone_forward(x_nchw, params["bb_w"], params["bb_b"])  # (B, Hf, Wf, Cf)
    B, Hf, Wf, Cf = feat.shape
    feat_bnc = feat.reshape(B, Hf * Wf, Cf)                          # free view
    return hybrid_embed_proj(feat_bnc, params["proj_w"], params["proj_b"])


# Pure-JAX reference (f32 end-to-end) for sanity check.
def hybrid_embed_forward_ref(x_nchw, params):
    feat = backbone_forward(x_nchw, params["bb_w"], params["bb_b"])
    B, Hf, Wf, Cf = feat.shape
    feat_bnc = feat.reshape(B, Hf * Wf, Cf)
    return feat_bnc @ params["proj_w"] + params["proj_b"]


if __name__ == "__main__":
    # Small shapes: batch=2, in_chans=4, img=16x16; backbone stride 4 ->
    # feature map 4x4 with feature_dim=8; embed_dim=32; num_patches=16.
    B, Cin, H, W = 2, 4, 16, 16
    Cfeat, E = 8, 32

    key = jax.random.PRNGKey(0)
    k1, k2, k3, k4, k5 = jax.random.split(key, 5)

    x = jax.random.normal(k1, (B, Cin, H, W), dtype=jnp.float32)

    params = {
        "bb_w": 0.1 * jax.random.normal(k2, (Cfeat, Cin, 3, 3), dtype=jnp.float32),
        "bb_b": 0.1 * jax.random.normal(k3, (Cfeat,), dtype=jnp.float32),
        # nn.Conv2d(feature_dim, embed_dim, 1): weight (E, Cfeat, 1, 1) -> (Cfeat, E)
        "proj_w": 0.1 * jax.random.normal(k4, (Cfeat, E), dtype=jnp.float32),
        "proj_b": 0.1 * jax.random.normal(k5, (E,), dtype=jnp.float32),
    }

    out = hybrid_embed_forward(x, params)
    out = jax.block_until_ready(out)

    ref = hybrid_embed_forward_ref(x, params)
    assert out.shape == (B, 4 * 4, E), out.shape
    # bf16 MXU operands with f32 accumulation -> loosened tolerance vs f32 ref.
    assert jnp.allclose(out, ref, atol=2e-2, rtol=2e-2)

    print("KERNEL_OK")
</pallas_src>

<mosaic_0001>
module attributes {stable_mosaic.version = 11 : i64} {
  func.func @_proj_kernel(%arg0: i32, %arg1: i32, %arg2: memref<32x8xbf16, #tpu.memory_space<vmem>>, %arg3: memref<8x128xbf16, #tpu.memory_space<vmem>>, %arg4: memref<1x128xf32, #tpu.memory_space<vmem>>, %arg5: memref<32x128xf32, #tpu.memory_space<vmem>>) attributes {dimension_semantics = [#tpu.dimension_semantics<parallel>, #tpu.dimension_semantics<parallel>], iteration_bounds = array<i64: 1, 1>, scalar_prefetch = 0 : i64, scratch_operands = 0 : i64, tpu.core_type = #tpu.core_type<tc>, window_params = [{transform_indices = @transform_0, window_bounds = array<i64: 32, 8>}, {transform_indices = @transform_1, window_bounds = array<i64: 8, 128>}, {transform_indices = @transform_2, window_bounds = array<i64: 1, 128>}, {transform_indices = @transform_3, window_bounds = array<i64: 32, 128>}]} {
    %c0 = arith.constant 0 : index
    %c0_0 = arith.constant 0 : index
    %0 = vector.load %arg2[%c0, %c0_0] : memref<32x8xbf16, #tpu.memory_space<vmem>>, vector<32x8xbf16>
    %c0_1 = arith.constant 0 : index
    %c0_2 = arith.constant 0 : index
    %1 = vector.load %arg3[%c0_1, %c0_2] : memref<8x128xbf16, #tpu.memory_space<vmem>>, vector<8x128xbf16>
    %cst = arith.constant dense<0.000000e+00> : vector<32x128xf32>
    %2 = tpu.matmul %0, %1, %cst {dimension_numbers = #tpu.dot_dimension_numbers<[1], [0], [0], [1], [0, 0, 1, 1], [], []>} : vector<32x8xbf16>, vector<8x128xbf16>, vector<32x128xf32> -> vector<32x128xf32>
    %c0_3 = arith.constant 0 : index
    %c0_4 = arith.constant 0 : index
    %3 = vector.load %arg4[%c0_3, %c0_4] : memref<1x128xf32, #tpu.memory_space<vmem>>, vector<1x128xf32>
    %4 = vector.broadcast %3 : vector<1x128xf32> to vector<32x128xf32>
    %5 = arith.addf %2, %4 : vector<32x128xf32>
    %c0_5 = arith.constant 0 : index
    %c0_6 = arith.constant 0 : index
    %6 = vector.load %arg5[%c0_5, %c0_6] : memref<32x128xf32, #tpu.memory_space<vmem>>, vector<32x128xf32>
    tpu.vector_store %arg5[%c0_5, %c0_6], %5 {strides = array<i32>} : memref<32x128xf32, #tpu.memory_space<vmem>>, vector<32x128xf32>,
    return
  }
  func.func @transform_0(%arg0: i32, %arg1: i32) -> (i32, i32) {
    %c0_i32 = arith.constant 0 : i32
    %c0_i32_0 = arith.constant 0 : i32
    return %arg0, %c0_i32 : i32, i32
  }
  func.func @transform_1(%arg0: i32, %arg1: i32) -> (i32, i32) {
    %c0_i32 = arith.constant 0 : i32
    %c0_i32_0 = arith.constant 0 : i32
    return %c0_i32, %arg1 : i32, i32
  }
  func.func @transform_2(%arg0: i32, %arg1: i32) -> (i32, i32) {
    %c0_i32 = arith.constant 0 : i32
    %c0_i32_0 = arith.constant 0 : i32
    return %c0_i32, %arg1 : i32, i32
  }
  func.func @transform_3(%arg0: i32, %arg1: i32) -> (i32, i32) {
    %c0_i32 = arith.constant 0 : i32
    return %arg0, %arg1 : i32, i32
  }
}

</mosaic_0001>

<bundles_post_ra>
// kernel: tpu_custom_call.1
= control target key start
LH: loop header
LB: loop body
LE: loop exit
PB: predicated region body
PF: predicated region fallthrough
CT: control target
= control target key end

     0   :  { %vm42_vm0 = vcmask 1043456   ;;  %vm35_vm1 = vcmask 64512   ;;  %s168_s0 = inlined_call_operand.vmem [shape: bf16[32,8], index: 0, kind: input, shape index: {}]   ;;  %s169_s1 = inlined_call_operand.vmem [shape: bf16[8,128], index: 1, kind: input, shape index: {}]   ;;  %s170_s2 = inlined_call_operand.vmem [shape: f32[1,128], index: 2, kind: input, shape index: {}]   ;;  %s171_s3 = inlined_call_operand.hbm [shape: f32[32,128], index: 3, kind: output, shape index: {}]  }
   0x1   :  { %v20_v0 = vld [vmem:[%s169_s1] sm:$0xf]  ;;  %v98_v3 = vld [vmem:[%s168_s0 + $0x8] sm:$0xff] }
   0x2   :  { %v44_v1 = vsel %vm42_vm0, %v20_v0, 0  ;;  %v97_v2 = vld [vmem:[%s168_s0] sm:$0xff] }
   0x3   :  { %53 = vmatpush.bf16.msra.mxu0 %v44_v1  ;;  %99 = vmatpush.bf16.msra.mxu1 %v44_v1 }
   0x4   :  { %8 = vsyncpa [#allocation3], 0  ;;  %v103_v4 = vld [vmem:[%s170_s2] ss:$0 sm:$0xff]  ;;  %s130_s1 = smov [#allocation2]   ;;  %s75_s22 = sshll.u32 %s171_s3, 4  ;;  %s76_s22 = int_to_ptr.hbm [resolvable:$true] %s75_s22 }
   0x5   :  { %s73_s20 = sshll.u32 %s130_s1, 4  ;;  %s131_s2 = smov 128   ;;  %s74_s20 = int_to_ptr.vmem [resolvable:$true] %s73_s20 }
   0x6   :  { %95 = vmatmul.msk.bf16.vlgmr.msra.gmra.mxu0 %vm35_vm1, %v97_v2  ;;  %96 = vmatmul.msk.bf16.vlgmr.msra.gmra.mxu1 %vm35_vm1, %v98_v3  ;;  %s132_s23 = smov 8  }
  0x83   :  { %v55_v5 = vpop.f32.mrf.mxu0  ;;  %v60_v6 = vpop.f32.mrf.mxu1 }
  0x84   :  { %v56_v7 = vadd.f32 %v103_v4, %v55_v5  ;;  %v61_v8 = vadd.f32 %v103_v4, %v60_v6 }
  0x86   :  { %65 = vst [vmem:[#allocation2] sm:$0xff] %v56_v7 }
  0x87   :  { %67 = vst [vmem:[#allocation2 + $0x10] sm:$0xff] %v61_v8 }
  0x8b   :  { %v57_v9 = vpop.f32.mrf.mxu0  ;;  %v62_v10 = vpop.f32.mrf.mxu1 }
  0x8c   :  { %v58_v11 = vadd.f32 %v103_v4, %v57_v9  ;;  %v63_v12 = vadd.f32 %v103_v4, %v62_v10 }
  0x8e   :  { %66 = vst [vmem:[#allocation2 + $0x8] sm:$0xff] %v58_v11 }
  0x8f   :  { %68 = vst [vmem:[#allocation2 + $0x18] sm:$0xff] %v63_v12 }
  0x90   :  { %81 = dma.vmem_to_hbm [thread:$0]  %s74_s20, 512, %s76_s22, [#allocation3], %s131_s2, %s131_s2, %s132_s23  }
  0x91   :  { %128 = dma.done.wait [#allocation3], 512  }
  0x92   :  { %129 = vsyncadd [#allocation3], 4294966784 }
  0x93   :  { %86 = vsyncpa [#allocation3], 1 }

</bundles_post_ra>
